<compile_context>
chip_gen: v7x
topology: tpu7x:2x2x1
jax: 0.10.0
libtpu: 0.0.40
codegen_flags: <defaults>
</compile_context>

<pallas_src>
import functools
import math

import numpy as np
import jax
import jax.numpy as jnp
from jax import lax
from jax.experimental import pallas as pl
from jax.experimental.pallas import tpu as pltpu

_LN_EPS = 1e-5  # torch nn.LayerNorm default


# -----------------------------------------------------------------------------
# Pallas kernel: fused LayerNorm1 -> MSA -> residual -> LayerNorm2
# for one batch element (all heads).
# -----------------------------------------------------------------------------
def _block_front_kernel(x_ref, wqkv_ref, bqkv_ref, ln_ref, o_ref, *, n_heads, d_head):
    # x_ref:    (1, S, D)  f32   one batch element, heads packed along D
    # wqkv_ref: (D, 3*D)   bf16  block-diagonal per head; columns = [q | k | v]
    # bqkv_ref: (1, 3*D)   f32
    # ln_ref:   (4, D)     f32   rows = [gamma1, beta1, gamma2, beta2]
    # o_ref:    (1, S, D)  f32   LayerNorm2(x + MSA(LayerNorm1(x)))
    d = n_heads * d_head
    x = x_ref[0]                                                   # (S, D) f32

    g1 = ln_ref[0:1, :]
    b1 = ln_ref[1:2, :]
    g2 = ln_ref[2:3, :]
    b2 = ln_ref[3:4, :]

    # ---- LayerNorm1 (f32) ----------------------------------------------------
    mu = jnp.mean(x, axis=-1, keepdims=True)
    var = jnp.mean((x - mu) ** 2, axis=-1, keepdims=True)
    xn = (x - mu) * lax.rsqrt(var + _LN_EPS) * g1 + b1             # (S, D) f32

    # ---- single fused QKV matmul for all heads (bf16 MXU, f32 acc) ------------
    qkv = jnp.dot(xn.astype(jnp.bfloat16), wqkv_ref[...],
                  preferred_element_type=jnp.float32) + bqkv_ref[...]   # (S, 3D)

    # ---- per-head softmax attention (static unroll over heads) ---------------
    scale = 1.0 / math.sqrt(d_head)
    head_outs = []
    for h in range(n_heads):
        lo = h * d_head
        q = qkv[:, lo:lo + d_head]                                 # (S, d_head) f32
        k = qkv[:, d + lo:d + lo + d_head]
        v = qkv[:, 2 * d + lo:2 * d + lo + d_head]

        # scores = q @ k^T, contracting the last dim of both (no k relayout).
        s = lax.dot_general(q, k,
                            dimension_numbers=(((1,), (1,)), ((), ())),
                            preferred_element_type=jnp.float32) * scale  # (S, S)

        # softmax along the key axis, in f32.
        s = s - jnp.max(s, axis=-1, keepdims=True)
        e = jnp.exp(s)
        p = e * pl.reciprocal(jnp.sum(e, axis=-1, keepdims=True), approx=True)

        # attention @ v (bf16 MXU operands, f32 accumulation).
        head_outs.append(jnp.dot(p.astype(jnp.bfloat16), v.astype(jnp.bfloat16),
                                 preferred_element_type=jnp.float32))   # (S, d_head)

    msa = jnp.concatenate(head_outs, axis=-1)                      # (S, D) torch.hstack

    # ---- residual + LayerNorm2 (f32), single lane-dense store -----------------
    hres = x + msa
    mu2 = jnp.mean(hres, axis=-1, keepdims=True)
    var2 = jnp.mean((hres - mu2) ** 2, axis=-1, keepdims=True)
    o_ref[0] = ((hres - mu2) * lax.rsqrt(var2 + _LN_EPS) * g2 + b2).astype(o_ref.dtype)


@functools.lru_cache(maxsize=None)
def _block_front_callable(B, S, D, n_heads):
    d_head = D // n_heads
    return pl.pallas_call(
        functools.partial(_block_front_kernel, n_heads=n_heads, d_head=d_head),
        out_shape=jax.ShapeDtypeStruct((B, S, D), jnp.float32),
        grid=(B,),
        in_specs=[
            pl.BlockSpec((1, S, D), lambda bi: (bi, 0, 0)),      # activation (f32)
            pl.BlockSpec((D, 3 * D), lambda bi: (0, 0)),         # fused QKV weight (bf16)
            pl.BlockSpec((1, 3 * D), lambda bi: (0, 0)),         # fused QKV bias (f32)
            pl.BlockSpec((4, D), lambda bi: (0, 0)),             # LN params [g1,b1,g2,b2]
        ],
        out_specs=pl.BlockSpec((1, S, D), lambda bi: (bi, 0, 0)),
        compiler_params=pltpu.CompilerParams(
            dimension_semantics=("parallel",)),
    )


def _fuse_qkv_params(wq, wk, wv, bq, bk, bv):
    """Build the fused block-diagonal QKV weight/bias.

    wq/wk/wv: (H, d_head, d_head) in torch nn.Linear layout (out, in)
    bq/bk/bv: (H, d_head)
    Returns W (D, 3D), b (1, 3D) such that x_(S,D) @ W + b == [q | k | v] with
    q[:, h*dh:(h+1)*dh] == x[:, h*dh:(h+1)*dh] @ wq[h].T + bq[h], etc.
    """
    n_heads, d_head, _ = wq.shape
    d = n_heads * d_head

    def blockdiag(w):
        out = jnp.zeros((d, d), dtype=jnp.float32)
        for h in range(n_heads):
            sl = slice(h * d_head, (h + 1) * d_head)
            out = out.at[sl, sl].set(w[h].T)
        return out

    W = jnp.concatenate([blockdiag(wq), blockdiag(wk), blockdiag(wv)], axis=1)
    b = jnp.concatenate([bq.reshape(-1), bk.reshape(-1), bv.reshape(-1)])[None, :]
    return W, b.astype(jnp.float32)


def block_front_pallas(x, blk, n_heads):
    """Fused LN1 + MSA + residual + LN2 for one MyViTBlock.  x: (B, S, D) f32."""
    B, S, D = x.shape
    assert D % n_heads == 0
    W, b = _fuse_qkv_params(blk["wq"], blk["wk"], blk["wv"],
                            blk["bq"], blk["bk"], blk["bv"])
    ln = jnp.stack([blk["ln1_g"], blk["ln1_b"], blk["ln2_g"], blk["ln2_b"]])
    call = _block_front_callable(B, S, D, n_heads)
    return call(x.astype(jnp.float32), W.astype(jnp.bfloat16), b,
                ln.astype(jnp.float32))


# -----------------------------------------------------------------------------
# Pure-JAX f32 references (mirror the PyTorch modules exactly).
# -----------------------------------------------------------------------------
def _layer_norm(x, gamma, beta, eps=_LN_EPS):
    mu = jnp.mean(x, axis=-1, keepdims=True)
    var = jnp.mean((x - mu) ** 2, axis=-1, keepdims=True)
    return (x - mu) / jnp.sqrt(var + eps) * gamma + beta


def my_msa_reference(x, wq, wk, wv, bq, bk, bv, n_heads):
    B, S, D = x.shape
    d_head = D // n_heads
    xh = x.reshape(B, S, n_heads, d_head)
    q = jnp.einsum('bshd,hed->bshe', xh, wq) + bq[None, None]
    k = jnp.einsum('bshd,hed->bshe', xh, wk) + bk[None, None]
    v = jnp.einsum('bshd,hed->bshe', xh, wv) + bv[None, None]
    s = jnp.einsum('bshe,bthe->bhst', q, k) / math.sqrt(d_head)
    a = jax.nn.softmax(s, axis=-1)
    o = jnp.einsum('bhst,bthe->bshe', a, v)
    return o.reshape(B, S, D)


def block_front_reference(x, blk, n_heads):
    msa = my_msa_reference(_layer_norm(x, blk["ln1_g"], blk["ln1_b"]),
                           blk["wq"], blk["wk"], blk["wv"],
                           blk["bq"], blk["bk"], blk["bv"], n_heads)
    return _layer_norm(x + msa, blk["ln2_g"], blk["ln2_b"])


# -----------------------------------------------------------------------------
# MyViT glue (plain JAX) around the fused Pallas block-front kernel.
# -----------------------------------------------------------------------------
def get_positional_embeddings(sequence_length, d):
    # Faithful to the PyTorch helper, including the odd-j sin(cos(...)) branch.
    result = np.ones((sequence_length, d), dtype=np.float32)
    for i in range(sequence_length):
        for j in range(d):
            if j % 2 == 0:
                result[i, j] = np.sin(i / 10000 ** (j / d))
            else:
                result[i, j] = np.sin(np.cos(i / 10000 ** (j * i / d)))
    return jnp.asarray(result)


def patchify(images, n_patches):
    B, C, H, W = images.shape
    assert H == W, "square images only"
    ps = H // n_patches
    x = images.reshape(B, C, n_patches, ps, n_patches, ps)
    x = x.transpose(0, 2, 4, 1, 3, 5)                    # (B, np, np, C, ps, ps)
    return x.reshape(B, n_patches * n_patches, C * ps * ps)


def _linear(x, w, b):
    return x @ w.T + b


def _vit_block(blk, x, front_fn, n_heads):
    # front_fn computes h2 = LayerNorm2(x + MSA(LayerNorm1(x)))
    h2 = front_fn(x, blk, n_heads)
    mlp = _linear(jax.nn.gelu(_linear(h2, blk["mlp_w1"], blk["mlp_b1"]),
                              approximate=False),
                  blk["mlp_w2"], blk["mlp_b2"])
    return h2 + mlp          # exactly: norm2(out) + mlp(norm2(out)), as in the module


def vit_forward(params, images, front_fn, n_patches, n_heads):
    # TODO(synk): patch embedding, exact-erf GELU MLP and classifier head run as
    # plain JAX (XLA) ops; LayerNorms + MSA + residual run in the Pallas kernel.
    B = images.shape[0]
    hidden_d = params["cls"].shape[-1]
    patches = patchify(images, n_patches)                          # (B, np^2, input_d)
    tokens = _linear(patches, params["map_w"], params["map_b"])    # (B, np^2, hidden)
    cls = jnp.broadcast_to(params["cls"][None], (B, 1, hidden_d))
    tokens = jnp.concatenate([cls, tokens], axis=1)                # (B, S, hidden)
    out = tokens * params["pos_embed"][None]                       # elementwise *, as in module
    for blk in params["blocks"]:
        out = _vit_block(blk, out, front_fn, n_heads)
    logits = _linear(out[:, 0], params["head_w"], params["head_b"])
    return jax.nn.softmax(logits, axis=-1)


# -----------------------------------------------------------------------------
# Deterministic nn.Linear-style parameter initialisation.
# -----------------------------------------------------------------------------
def _init_linear(key, in_f, out_f):
    kw, kb = jax.random.split(key)
    bound = 1.0 / math.sqrt(in_f)
    w = jax.random.uniform(kw, (out_f, in_f), jnp.float32, -bound, bound)
    b = jax.random.uniform(kb, (out_f,), jnp.float32, -bound, bound)
    return w, b


def _init_head_linears(key, d_head, n_heads):
    ws, bs = [], []
    for k in jax.random.split(key, n_heads):
        w, b = _init_linear(k, d_head, d_head)
        ws.append(w)
        bs.append(b)
    return jnp.stack(ws), jnp.stack(bs)


def init_vit_params(key, chw, n_patches, n_blocks, hidden_d, n_heads, out_d, mlp_ratio=4):
    C, H, W = chw
    input_d = C * (H // n_patches) * (W // n_patches)
    d_head = hidden_d // n_heads
    seq_len = n_patches ** 2 + 1

    keys = jax.random.split(key, 3 + n_blocks)
    map_w, map_b = _init_linear(keys[0], input_d, hidden_d)
    cls = jax.random.uniform(keys[1], (1, hidden_d), jnp.float32, 0.0, 1.0)  # torch.rand
    head_w, head_b = _init_linear(keys[2], hidden_d, out_d)

    blocks = []
    for bi in range(n_blocks):
        kq, kk, kv, km1, km2 = jax.random.split(keys[3 + bi], 5)
        wq, bq = _init_head_linears(kq, d_head, n_heads)
        wk, bk = _init_head_linears(kk, d_head, n_heads)
        wv, bv = _init_head_linears(kv, d_head, n_heads)
        mlp_w1, mlp_b1 = _init_linear(km1, hidden_d, mlp_ratio * hidden_d)
        mlp_w2, mlp_b2 = _init_linear(km2, mlp_ratio * hidden_d, hidden_d)
        blocks.append(dict(
            ln1_g=jnp.ones((hidden_d,), jnp.float32), ln1_b=jnp.zeros((hidden_d,), jnp.float32),
            ln2_g=jnp.ones((hidden_d,), jnp.float32), ln2_b=jnp.zeros((hidden_d,), jnp.float32),
            wq=wq, wk=wk, wv=wv, bq=bq, bk=bk, bv=bv,
            mlp_w1=mlp_w1, mlp_b1=mlp_b1, mlp_w2=mlp_w2, mlp_b2=mlp_b2))

    return dict(map_w=map_w, map_b=map_b, cls=cls,
                pos_embed=get_positional_embeddings(seq_len, hidden_d),
                blocks=blocks, head_w=head_w, head_b=head_b)


if __name__ == "__main__":
    # Small MyViT config: 1x16x16 images, 4x4 patches (input_d=16), 17 tokens
    # with the class token, hidden_d=32, 2 heads (d_head=16), 2 blocks, 10 classes.
    B = 2
    chw = (1, 16, 16)
    n_patches = 4
    n_blocks = 2
    hidden_d = 32
    n_heads = 2
    out_d = 10
    seq_len = n_patches ** 2 + 1

    root = jax.random.PRNGKey(0)
    k_params, k_img, k_x = jax.random.split(root, 3)

    params = init_vit_params(k_params, chw, n_patches, n_blocks, hidden_d, n_heads, out_d)
    images = jax.random.normal(k_img, (B,) + chw, dtype=jnp.float32)

    # --- 1) standalone check of the fused block-front kernel vs pure JAX --------
    blk0 = params["blocks"][0]
    x_test = jax.random.normal(k_x, (B, seq_len, hidden_d), dtype=jnp.float32)
    front_out = jax.block_until_ready(block_front_pallas(x_test, blk0, n_heads))
    front_ref = block_front_reference(x_test, blk0, n_heads)
    assert front_out.shape == (B, seq_len, hidden_d), front_out.shape
    # bf16 MXU operands -> compare against the f32 reference with a relaxed tol.
    assert jnp.allclose(front_out, front_ref, atol=2e-2, rtol=2e-2), \
        "fused block-front kernel mismatch"

    # --- 2) end-to-end MyViT forward using the Pallas kernel inside every block -
    out = jax.block_until_ready(
        vit_forward(params, images, block_front_pallas, n_patches, n_heads))
    ref = vit_forward(params, images, block_front_reference, n_patches, n_heads)
    assert out.shape == (B, out_d), out.shape
    assert jnp.allclose(jnp.sum(out, axis=-1), 1.0, atol=1e-4), "softmax rows must sum to 1"
    assert jnp.allclose(out, ref, atol=2e-2, rtol=2e-2), "ViT forward mismatch"

    print("KERNEL_OK")
</pallas_src>

<mosaic_0001>
module attributes {stable_mosaic.version = 11 : i64} {
  func.func @_block_front_kernel(%arg0: i32, %arg1: memref<1x17x32xf32, #tpu.memory_space<vmem>>, %arg2: memref<32x96xbf16, #tpu.memory_space<vmem>>, %arg3: memref<1x96xf32, #tpu.memory_space<vmem>>, %arg4: memref<4x32xf32, #tpu.memory_space<vmem>>, %arg5: memref<1x17x32xf32, #tpu.memory_space<vmem>>) attributes {dimension_semantics = [#tpu.dimension_semantics<parallel>], iteration_bounds = array<i64: 2>, scalar_prefetch = 0 : i64, scratch_operands = 0 : i64, tpu.core_type = #tpu.core_type<tc>, window_params = [{transform_indices = @transform_0, window_bounds = array<i64: 1, 17, 32>}, {pipeline_mode = #tpu.pipeline_mode<synchronous>, transform_indices = @transform_1, window_bounds = array<i64: 32, 96>}, {pipeline_mode = #tpu.pipeline_mode<synchronous>, transform_indices = @transform_2, window_bounds = array<i64: 1, 96>}, {pipeline_mode = #tpu.pipeline_mode<synchronous>, transform_indices = @transform_3, window_bounds = array<i64: 4, 32>}, {transform_indices = @transform_4, window_bounds = array<i64: 1, 17, 32>}]} {
    %c0 = arith.constant 0 : index
    %c0_0 = arith.constant 0 : index
    %c0_1 = arith.constant 0 : index
    %0 = vector.load %arg1[%c0, %c0_0, %c0_1] : memref<1x17x32xf32, #tpu.memory_space<vmem>>, vector<1x17x32xf32>
    %1 = vector.shape_cast %0 : vector<1x17x32xf32> to vector<17x32xf32>
    %c0_2 = arith.constant 0 : index
    %c0_3 = arith.constant 0 : index
    %2 = vector.load %arg4[%c0_2, %c0_3] : memref<4x32xf32, #tpu.memory_space<vmem>>, vector<1x32xf32>
    %c1 = arith.constant 1 : index
    %c0_4 = arith.constant 0 : index
    %3 = vector.load %arg4[%c1, %c0_4] : memref<4x32xf32, #tpu.memory_space<vmem>>, vector<1x32xf32>
    %c2 = arith.constant 2 : index
    %c0_5 = arith.constant 0 : index
    %4 = vector.load %arg4[%c2, %c0_5] : memref<4x32xf32, #tpu.memory_space<vmem>>, vector<1x32xf32>
    %c3 = arith.constant 3 : index
    %c0_6 = arith.constant 0 : index
    %5 = vector.load %arg4[%c3, %c0_6] : memref<4x32xf32, #tpu.memory_space<vmem>>, vector<1x32xf32>
    %cst = arith.constant dense<0.000000e+00> : vector<17xf32>
    %6 = vector.multi_reduction <add>, %1, %cst [1] : vector<17x32xf32> to vector<17xf32>
    %7 = vector.shape_cast %6 : vector<17xf32> to vector<17x1xf32>
    %cst_7 = arith.constant 3.200000e+01 : f32
    %8 = vector.broadcast %cst_7 : f32 to vector<17x1xf32>
    %9 = arith.divf %7, %8 : vector<17x1xf32>
    %10 = vector.broadcast %9 : vector<17x1xf32> to vector<17x32xf32>
    %11 = arith.subf %1, %10 : vector<17x32xf32>
    %12 = arith.mulf %11, %11 : vector<17x32xf32>
    %cst_8 = arith.constant dense<0.000000e+00> : vector<17xf32>
    %13 = vector.multi_reduction <add>, %12, %cst_8 [1] : vector<17x32xf32> to vector<17xf32>
    %14 = vector.shape_cast %13 : vector<17xf32> to vector<17x1xf32>
    %cst_9 = arith.constant 3.200000e+01 : f32
    %15 = vector.broadcast %cst_9 : f32 to vector<17x1xf32>
    %16 = arith.divf %14, %15 : vector<17x1xf32>
    %17 = vector.broadcast %9 : vector<17x1xf32> to vector<17x32xf32>
    %18 = arith.subf %1, %17 : vector<17x32xf32>
    %cst_10 = arith.constant 9.99999974E-6 : f32
    %19 = vector.broadcast %cst_10 : f32 to vector<17x1xf32>
    %20 = arith.addf %16, %19 : vector<17x1xf32>
    %21 = math.rsqrt %20 : vector<17x1xf32>
    %22 = vector.broadcast %21 : vector<17x1xf32> to vector<17x32xf32>
    %23 = arith.mulf %18, %22 : vector<17x32xf32>
    %24 = vector.broadcast %2 : vector<1x32xf32> to vector<17x32xf32>
    %25 = arith.mulf %23, %24 : vector<17x32xf32>
    %26 = vector.broadcast %3 : vector<1x32xf32> to vector<17x32xf32>
    %27 = arith.addf %25, %26 : vector<17x32xf32>
    %28 = arith.truncf %27 : vector<17x32xf32> to vector<17x32xbf16>
    %c0_11 = arith.constant 0 : index
    %c0_12 = arith.constant 0 : index
    %29 = vector.load %arg2[%c0_11, %c0_12] : memref<32x96xbf16, #tpu.memory_space<vmem>>, vector<32x96xbf16>
    %cst_13 = arith.constant dense<0.000000e+00> : vector<17x96xf32>
    %30 = tpu.matmul %28, %29, %cst_13 {dimension_numbers = #tpu.dot_dimension_numbers<[1], [0], [0], [1], [0, 0, 1, 1], [], []>} : vector<17x32xbf16>, vector<32x96xbf16>, vector<17x96xf32> -> vector<17x96xf32>
    %c0_14 = arith.constant 0 : index
    %c0_15 = arith.constant 0 : index
    %31 = vector.load %arg3[%c0_14, %c0_15] : memref<1x96xf32, #tpu.memory_space<vmem>>, vector<1x96xf32>
    %32 = vector.broadcast %31 : vector<1x96xf32> to vector<17x96xf32>
    %33 = arith.addf %30, %32 : vector<17x96xf32>
    %34 = vector.extract_strided_slice %33 {offsets = [0, 0], sizes = [17, 16], strides = [1, 1]} : vector<17x96xf32> to vector<17x16xf32>
    %35 = vector.extract_strided_slice %33 {offsets = [0, 32], sizes = [17, 16], strides = [1, 1]} : vector<17x96xf32> to vector<17x16xf32>
    %36 = vector.extract_strided_slice %33 {offsets = [0, 64], sizes = [17, 16], strides = [1, 1]} : vector<17x96xf32> to vector<17x16xf32>
    %cst_16 = arith.constant dense<0.000000e+00> : vector<17x17xf32>
    %37 = tpu.matmul %34, %35, %cst_16 {dimension_numbers = #tpu.dot_dimension_numbers<[1], [1], [0], [0], [0, 0, 1, 0], [], []>} : vector<17x16xf32>, vector<17x16xf32>, vector<17x17xf32> -> vector<17x17xf32>
    %cst_17 = arith.constant 2.500000e-01 : f32
    %38 = vector.broadcast %cst_17 : f32 to vector<17x17xf32>
    %39 = arith.mulf %37, %38 : vector<17x17xf32>
    %cst_18 = arith.constant dense<0xFF800000> : vector<17xf32>
    %40 = vector.multi_reduction <maximumf>, %39, %cst_18 [1] : vector<17x17xf32> to vector<17xf32>
    %41 = vector.shape_cast %40 : vector<17xf32> to vector<17x1xf32>
    %42 = vector.broadcast %41 : vector<17x1xf32> to vector<17x17xf32>
    %43 = arith.subf %39, %42 : vector<17x17xf32>
    %44 = math.exp %43 : vector<17x17xf32>
    %cst_19 = arith.constant dense<0.000000e+00> : vector<17xf32>
    %45 = vector.multi_reduction <add>, %44, %cst_19 [1] : vector<17x17xf32> to vector<17xf32>
    %46 = vector.shape_cast %45 : vector<17xf32> to vector<17x1xf32>
    %47 = tpu.reciprocal %46 {approx = true} : vector<17x1xf32> -> vector<17x1xf32>
    %48 = vector.broadcast %47 : vector<17x1xf32> to vector<17x17xf32>
    %49 = arith.mulf %44, %48 : vector<17x17xf32>
    %50 = arith.truncf %49 : vector<17x17xf32> to vector<17x17xbf16>
    %51 = arith.truncf %36 : vector<17x16xf32> to vector<17x16xbf16>
    %cst_20 = arith.constant dense<0.000000e+00> : vector<17x16xf32>
    %52 = tpu.matmul %50, %51, %cst_20 {dimension_numbers = #tpu.dot_dimension_numbers<[1], [0], [0], [1], [0, 0, 1, 1], [], []>} : vector<17x17xbf16>, vector<17x16xbf16>, vector<17x16xf32> -> vector<17x16xf32>
    %53 = vector.extract_strided_slice %33 {offsets = [0, 16], sizes = [17, 16], strides = [1, 1]} : vector<17x96xf32> to vector<17x16xf32>
    %54 = vector.extract_strided_slice %33 {offsets = [0, 48], sizes = [17, 16], strides = [1, 1]} : vector<17x96xf32> to vector<17x16xf32>
    %55 = vector.extract_strided_slice %33 {offsets = [0, 80], sizes = [17, 16], strides = [1, 1]} : vector<17x96xf32> to vector<17x16xf32>
    %cst_21 = arith.constant dense<0.000000e+00> : vector<17x17xf32>
    %56 = tpu.matmul %53, %54, %cst_21 {dimension_numbers = #tpu.dot_dimension_numbers<[1], [1], [0], [0], [0, 0, 1, 0], [], []>} : vector<17x16xf32>, vector<17x16xf32>, vector<17x17xf32> -> vector<17x17xf32>
    %cst_22 = arith.constant 2.500000e-01 : f32
    %57 = vector.broadcast %cst_22 : f32 to vector<17x17xf32>
    %58 = arith.mulf %56, %57 : vector<17x17xf32>
    %cst_23 = arith.constant dense<0xFF800000> : vector<17xf32>
    %59 = vector.multi_reduction <maximumf>, %58, %cst_23 [1] : vector<17x17xf32> to vector<17xf32>
    %60 = vector.shape_cast %59 : vector<17xf32> to vector<17x1xf32>
    %61 = vector.broadcast %60 : vector<17x1xf32> to vector<17x17xf32>
    %62 = arith.subf %58, %61 : vector<17x17xf32>
    %63 = math.exp %62 : vector<17x17xf32>
    %cst_24 = arith.constant dense<0.000000e+00> : vector<17xf32>
    %64 = vector.multi_reduction <add>, %63, %cst_24 [1] : vector<17x17xf32> to vector<17xf32>
    %65 = vector.shape_cast %64 : vector<17xf32> to vector<17x1xf32>
    %66 = tpu.reciprocal %65 {approx = true} : vector<17x1xf32> -> vector<17x1xf32>
    %67 = vector.broadcast %66 : vector<17x1xf32> to vector<17x17xf32>
    %68 = arith.mulf %63, %67 : vector<17x17xf32>
    %69 = arith.truncf %68 : vector<17x17xf32> to vector<17x17xbf16>
    %70 = arith.truncf %55 : vector<17x16xf32> to vector<17x16xbf16>
    %cst_25 = arith.constant dense<0.000000e+00> : vector<17x16xf32>
    %71 = tpu.matmul %69, %70, %cst_25 {dimension_numbers = #tpu.dot_dimension_numbers<[1], [0], [0], [1], [0, 0, 1, 1], [], []>} : vector<17x17xbf16>, vector<17x16xbf16>, vector<17x16xf32> -> vector<17x16xf32>
    %72 = tpu.concatenate %52, %71 in 1 : vector<17x16xf32>, vector<17x16xf32> -> vector<17x32xf32>
    %73 = arith.addf %1, %72 : vector<17x32xf32>
    %cst_26 = arith.constant dense<0.000000e+00> : vector<17xf32>
    %74 = vector.multi_reduction <add>, %73, %cst_26 [1] : vector<17x32xf32> to vector<17xf32>
    %75 = vector.shape_cast %74 : vector<17xf32> to vector<17x1xf32>
    %cst_27 = arith.constant 3.200000e+01 : f32
    %76 = vector.broadcast %cst_27 : f32 to vector<17x1xf32>
    %77 = arith.divf %75, %76 : vector<17x1xf32>
    %78 = vector.broadcast %77 : vector<17x1xf32> to vector<17x32xf32>
    %79 = arith.subf %73, %78 : vector<17x32xf32>
    %80 = arith.mulf %79, %79 : vector<17x32xf32>
    %cst_28 = arith.constant dense<0.000000e+00> : vector<17xf32>
    %81 = vector.multi_reduction <add>, %80, %cst_28 [1] : vector<17x32xf32> to vector<17xf32>
    %82 = vector.shape_cast %81 : vector<17xf32> to vector<17x1xf32>
    %cst_29 = arith.constant 3.200000e+01 : f32
    %83 = vector.broadcast %cst_29 : f32 to vector<17x1xf32>
    %84 = arith.divf %82, %83 : vector<17x1xf32>
    %85 = vector.broadcast %77 : vector<17x1xf32> to vector<17x32xf32>
    %86 = arith.subf %73, %85 : vector<17x32xf32>
    %cst_30 = arith.constant 9.99999974E-6 : f32
    %87 = vector.broadcast %cst_30 : f32 to vector<17x1xf32>
    %88 = arith.addf %84, %87 : vector<17x1xf32>
    %89 = math.rsqrt %88 : vector<17x1xf32>
    %90 = vector.broadcast %89 : vector<17x1xf32> to vector<17x32xf32>
    %91 = arith.mulf %86, %90 : vector<17x32xf32>
    %92 = vector.broadcast %4 : vector<1x32xf32> to vector<17x32xf32>
    %93 = arith.mulf %91, %92 : vector<17x32xf32>
    %94 = vector.broadcast %5 : vector<1x32xf32> to vector<17x32xf32>
    %95 = arith.addf %93, %94 : vector<17x32xf32>
    %c0_31 = arith.constant 0 : index
    %c0_32 = arith.constant 0 : index
    %c0_33 = arith.constant 0 : index
    %96 = vector.load %arg5[%c0_31, %c0_32, %c0_33] : memref<1x17x32xf32, #tpu.memory_space<vmem>>, vector<1x17x32xf32>
    %97 = vector.shape_cast %96 : vector<1x17x32xf32> to vector<17x32xf32>
    %98 = vector.shape_cast %95 : vector<17x32xf32> to vector<1x17x32xf32>
    tpu.vector_store %arg5[%c0_31, %c0_32, %c0_33], %98 {strides = array<i32>} : memref<1x17x32xf32, #tpu.memory_space<vmem>>, vector<1x17x32xf32>,
    return
  }
  func.func @transform_0(%arg0: i32) -> (i32, i32, i32) {
    %c0_i32 = arith.constant 0 : i32
    %c0_i32_0 = arith.constant 0 : i32
    %c0_i32_1 = arith.constant 0 : i32
    return %arg0, %c0_i32, %c0_i32_0 : i32, i32, i32
  }
  func.func @transform_1(%arg0: i32) -> (i32, i32) {
    %c0_i32 = arith.constant 0 : i32
    %c0_i32_0 = arith.constant 0 : i32
    %c0_i32_1 = arith.constant 0 : i32
    return %c0_i32, %c0_i32_0 : i32, i32
  }
  func.func @transform_2(%arg0: i32) -> (i32, i32) {
    %c0_i32 = arith.constant 0 : i32
    %c0_i32_0 = arith.constant 0 : i32
    %c0_i32_1 = arith.constant 0 : i32
    return %c0_i32, %c0_i32_0 : i32, i32
  }
  func.func @transform_3(%arg0: i32) -> (i32, i32) {
    %c0_i32 = arith.constant 0 : i32
    %c0_i32_0 = arith.constant 0 : i32
    %c0_i32_1 = arith.constant 0 : i32
    return %c0_i32, %c0_i32_0 : i32, i32
  }
  func.func @transform_4(%arg0: i32) -> (i32, i32, i32) {
    %c0_i32 = arith.constant 0 : i32
    %c0_i32_0 = arith.constant 0 : i32
    %c0_i32_1 = arith.constant 0 : i32
    return %arg0, %c0_i32, %c0_i32_0 : i32, i32, i32
  }
}

</mosaic_0001>

<bundles_post_ra>
// kernel: tpu_custom_call.1
= control target key start
LH: loop header
LB: loop body
LE: loop exit
PB: predicated region body
PF: predicated region fallthrough
CT: control target
= control target key end

     0   :  { %s1115_s15 = smov 0   ;;  %s1249_s0 = inlined_call_operand.vmem [shape: f32[2,17,32], index: 0, kind: input, shape index: {}]   ;;  %s1250_s1 = inlined_call_operand.vmem [shape: bf16[32,96], index: 1, kind: input, shape index: {}]   ;;  %s1251_s2 = inlined_call_operand.vmem [shape: f32[1,96], index: 2, kind: input, shape index: {}]   ;;  %s1252_s3 = inlined_call_operand.vmem [shape: f32[4,32], index: 3, kind: input, shape index: {}]   ;;  %s1253_s4 = inlined_call_operand.vmem [shape: f32[2,17,32], index: 4, kind: output, shape index: {}]  }
   0x1 LB: > { %s885_s16 = sadd.s32 4294967295, %s1078_s15   ;;  %p889_p0 = scmp.ge.s32.totalorder %s1078_s15, 1  ;;  %s1078_s15 = sphi %s1115_s15, %s14_s15  }
   0x2   : > { %p162_p1 = scmp.lt.s32.totalorder %s1078_s15, 3 }
   0x4   : > { %p163_p2 = pnand %p889_p0, %p162_p1 }
   0x5   : > { %p188_p3 = scmp.lt.s32.totalorder (!%p163_p2), %s885_s16, 1  ;;  %vm206_vm0 = vcmask (!%p163_p2), 261120   ;;  %vm213_vm1 = vcmask (!%p163_p2), 253952   ;;  %v1034_v21 = vld [vmem:[%s1250_s1] sm:$0xff] (!%p163_p2)   ;;  %v1035_v22 = vld [vmem:[%s1250_s1 + $0x8] sm:$0xff] (!%p163_p2)   ;;  %v1080_v49 = vmov (!%p163_p2), 0.0|0.0  }
   0x6   : > { %166 = sbr.rel (%p163_p2) target bundleno = 1891 (0x763), region = 36  ;;  %943 = vmatprep.subr.bf16.mxu0 (!%p163_p2), %v1034_v21  ;;  %v892_v34 = vld [vmem:[%s1252_s3] ss:$0 sm:$0xff] (!%p163_p2)  ;;  %v893_v40 = vld [vmem:[%s1252_s3 + $0x1] ss:$0 sm:$0xff] (!%p163_p2)  ;;  %997 = vmatprep.subr.bf16.mxu1 (!%p163_p2), %v1080_v49  ;;  %s1081_s5 = smov (!%p163_p2), 96  }
   0x7   : > { %944 = vmatpush3.bf16.msra.mxu0 (!%p163_p2), %v1034_v21  ;;  %v894_v48 = vld [vmem:[%s1251_s2] ss:$0 sm:$0xff] (!%p163_p2)  ;;  %s1082_s6 = smov (!%p163_p2), 80   ;;  %vm1083_vm2 = vmmov (!%p163_p2), 0   ;;  %v1084_v58 = vmov (!%p163_p2), 0.0   ;;  %s1085_s7 = smov (!%p163_p2), 112  }
   0x8   : > { %945 = vmatprep.subr.bf16.mxu0 (!%p163_p2), %v1035_v22  ;;  %957 = vmatprep.mubr.msk.f32.mxu1 (!%p163_p2), %vm1083_vm2, %v1084_v58  ;;  %vm350_vm3 = vcmask (!%p163_p2), 130048   ;;  %vm446_vm5 = vcmask (!%p163_p2), 138240   ;;  %vm453_vm6 = vcmask (!%p163_p2), 131072   ;;  %s1086_s8 = smov (!%p163_p2), 64   ;;  %s1087_s9 = smov (!%p163_p2), 48   ;;  %vm498_vm7 = vcmask (!%p163_p2), 1040384  }
   0x9   : > { %vm999_vm4 = vmpackc.low (!%p163_p2), %vm350_vm3, %vm350_vm3  ;;  %s1089_s10 = smov (!%p163_p2), 16  }
   0xb   : > { %946 = vmatpush3.bf16.msra.mxu0 (!%p163_p2), %v1035_v22 }
   0xd   : > { %s1255_s16 = smov (!%p188_p3, %s885_s16), 1 }
   0xe   : > { %s1005_s17 = smul.u32 24, %s1255_s16 }
  0x10   : > { %s192_s20 = scalar_lea.vmem %s1249_s0, %s1005_s17 }
  0x11   : > { %v1131_v0 = vld [vmem:[%s192_s20] sm:$0xff]  ;;  %v1133_v1 = vld [vmem:[%s192_s20 + $0x10] sm:$0x1]  ;;  %v1135_v2 = vld [vmem:[%s192_s20 + $0x8] sm:$0xff]  ;;  %s197_s20 = scalar_lea.vmem %s1253_s4, %s1005_s17 }
  0x12   : > { %v207_v3 = vsel %vm206_vm0, %v1131_v0, 0.0  ;;  %v214_v4 = vsel %vm213_vm1, %v1133_v1, 0.0  ;;  %v210_v5 = vsel %vm206_vm0, %v1135_v2, 0.0 }
  0x13   : > { %208 = vadd.xlane.f32.xlu0 %v207_v3  ;;  %215 = vadd.xlane.f32.xlu1 %v214_v4 }
  0x17   : > { %211 = vadd.xlane.f32.xlu0 %v210_v5 }
  0xa0   : > { %v209_v6 = vpop.xlane.xlu0 %208  ;;  %v216_v7 = vpop.xlane.xlu1 %215 }
  0xa1   : > { %v218_v8 = vmul.f32 0.03125, %v209_v6  ;;  %v220_v9 = vmul.f32 0.03125, %v216_v7 }
  0xa3   : > { %v221_v10 = vsub.f32 %v1131_v0, %v218_v8  ;;  %v223_v11 = vsub.f32 %v1133_v1, %v220_v9 }
  0xa4   : > { %v212_v12 = vpop.xlane.xlu0 %211 }
  0xa5   : > { %v219_v13 = vmul.f32 0.03125, %v212_v12  ;;  %v224_v14 = vmul.f32 %v221_v10, %v221_v10  ;;  %v226_v15 = vmul.f32 %v223_v11, %v223_v11 }
  0xa7   : > { %v222_v16 = vsub.f32 %v1135_v2, %v219_v13  ;;  %v227_v17 = vsel %vm206_vm0, %v224_v14, 0.0  ;;  %v233_v18 = vsel %vm213_vm1, %v226_v15, 0.0 }
  0xa8   : > { %228 = vadd.xlane.f32.xlu1 %v227_v17 }
  0xa9   : > { %v225_v19 = vmul.f32 %v222_v16, %v222_v16 }
  0xab   : > { %v230_v20 = vsel %vm206_vm0, %v225_v19, 0.0 }
  0xac   : > { %234 = vadd.xlane.f32.xlu1 %v233_v18  ;;  %231 = vadd.xlane.f32.xlu0 %v230_v20 }
 0x135   : > { %v229_v23 = vpop.xlane.xlu1 %228 }
 0x136   : > { %v236_v24 = vmul.f32 0.03125, %v229_v23 }
 0x138   : > { %v239_v25 = vadd.f32 1e-05, %v236_v24 }
 0x139   : > { %v235_v26 = vpop.xlane.xlu1 %234  ;;  %v232_v27 = vpop.xlane.xlu0 %231 }
 0x13a   : > { %1036 = vrsqrt.f32 %v239_v25  ;;  %v238_v28 = vmul.f32 0.03125, %v235_v26  ;;  %v237_v29 = vmul.f32 0.03125, %v232_v27 }
 0x13c   : > { %v241_v30 = vadd.f32 1e-05, %v238_v28  ;;  %v240_v31 = vadd.f32 1e-05, %v237_v29 }
 0x13e   : > { %1038 = vrsqrt.f32 %v241_v30 }
 0x13f   : > { %1040 = vrsqrt.f32 %v240_v31 }
 0x144   : > { %v1037_v32 = vpop.eup %1036 }
 0x145   : > { %v245_v33 = vmul.f32 %v1037_v32, %v221_v10 }
 0x147   : > { %v252_v39 = vmul.f32 %v892_v34, %v245_v33 }
 0x148   : > { %v1039_v35 = vpop.eup %1038 }
 0x149   : > { %v1041_v36 = vpop.eup %1040  ;;  %v247_v37 = vmul.f32 %v1039_v35, %v223_v11  ;;  %v259_v44 = vadd.f32 %v893_v40, %v252_v39 }
 0x14a   : > { %v246_v38 = vmul.f32 %v1041_v36, %v222_v16 }
 0x14b   : > { %v254_v41 = vmul.f32 %v892_v34, %v247_v37 }
 0x14c   : > { %v253_v42 = vmul.f32 %v892_v34, %v246_v38 }
 0x14d   : > { %v261_v43 = vadd.f32 %v893_v40, %v254_v41 }
 0x14e   : > { %v260_v45 = vadd.f32 %v893_v40, %v253_v42 }
 0x14f   : > { %v263_v46 = vpack.c.bf16 %v261_v43, %v261_v43 }
 0x150   : > { %v262_v47 = vpack.c.bf16 %v260_v45, %v259_v44 }
 0x152   : > { %947 = vmatprep.mubr.msk.bf16.mxu0 %vm206_vm0, %v262_v47 }
 0x153   : > { %948 = vmatmul.mubr.msk.bf16.vlgmr.msra.gmra.mrb[0].mxu0 %vm206_vm0, %v263_v46 }
 0x226   : > { %v949_v50 = vpop.f32.mrb[0].mxu0 }
 0x227   : > { %v1166_v51 = vadd.f32 %v949_v50, %v894_v48  ;;  %v327_v52 = vpop.f32.mrb[1].mxu0 }
 0x228   : > { %v950_v53 = vpop.f32.mrb[2].mxu0  ;;  %v1169_v55 = vadd.f32 %v894_v48, %v327_v52 }
 0x229   : > { %348 = vrot.lane.b32.xlu1 %v1166_v51, %s1081_s5  ;;  %v330_v54 = vpop.f32.mrb[3].mxu0 }
 0x22a   : > { %v1171_v56 = vadd.f32 %v894_v48, %v330_v54 }
 0x22c   : > { %v1029_v57 = vpack.i.bf16 %v1171_v56, %v1169_v55  ;;  %v483_v35 = vpack.c.bf16 %v1171_v56, %v1169_v55 }
 0x22e   : > { %1030 = vrot.lane.b32.xlu1 %v1029_v57, %s1082_s6  ;;  %1025 = vrot.lane.b32.xlu0 %v1029_v57, %s1081_s5 }
 0x232   : > { %562 = vrot.lane.b32.xlu1 %v1166_v51, %s1082_s6  ;;  %552 = vrot.lane.b32.xlu0 %v1169_v55, %s1085_s7 }
 0x236   : > { %554 = vrot.lane.b32.xlu1 %v1171_v56, %s1085_s7  ;;  %556 = vrot.lane.b32.xlu0 %v1166_v51, %s1085_s7 }
 0x29b   : > { %v349_v62 = vpop.permute.xlu1 %348 }
 0x2a0   : > { %v1026_v59 = vpop.permute.xlu0 %1025  ;;  %v1031_v3 = vpop.permute.xlu1 %1030 }
 0x2a1   : > { %v1028_v60 = vunpack.i.h.bf16 %v1026_v59  ;;  %v1027_v61 = vunpack.i.l.bf16 %v1026_v59  ;;  %v1033_v4 = vunpack.i.h.bf16 %v1031_v3  ;;  %v1032_v5 = vunpack.i.l.bf16 %v1031_v3 }
 0x2a3   : > { %v998_v63 = vpack.c.bf16 %v1028_v60, %v1027_v61  ;;  %v1002_v6 = vpack.c.bf16 %v1033_v4, %v1032_v5 }
 0x2a4   : > { %v563_v7 = vpop.permute.xlu1 %562  ;;  %v553_v8 = vpop.permute.xlu0 %552 }
 0x2a5   : > { %1000 = vmatpush3.bf16.xpose.msk.msra.mxu1 %vm999_vm4, %v998_v63 }
 0x2a6   : > { %955 = vmatprep.subr.mxu1 %v1084_v58 }
 0x2a8   : > { %v555_v9 = vpop.permute.xlu1 %554  ;;  %v557_v10 = vpop.permute.xlu0 %556 }
 0x2ad   : > { %956 = vmatpush3.xpose.msk.msra.mxu1 %vm350_vm3, %v349_v62 }
 0x2ae   : > { %1001 = vmatprep.subr.bf16.mxu1 %v1080_v49 }
 0x2b0   : > { %958 = vmatmul.mubr.msk.f32.vlgmr.msra.gmra.mrb[0].mxu1 %vm350_vm3, %v1169_v55 }
 0x2b1   : > { %1004 = vmatpush3.bf16.xpose.msk.msra.mxu1 %vm999_vm4, %v1002_v6  ;;  %960 = vmatprep.mubr.msk.f32.mxu1 %vm1083_vm2, %v1084_v58 }
 0x2b2   : > { %978 = vmatprep.subr.mxu1 %v1084_v58 }
 0x2b4   : > { %961 = vmatmul.mubr.msk.f32.gmra.mrb[2].mxu1 %vm350_vm3, %v1171_v56 }
 0x2b5   : > { %963 = vmatprep.mubr.msk.f32.mxu1 %vm1083_vm2, %v1084_v58 }
 0x2b8   : > { %964 = vmatmul.mubr.msk.f32.gmra.mrb[4].mxu1 %vm350_vm3, %v1166_v51 }
 0x2b9   : > { %979 = vmatpush3.xpose.msk.msra.mxu1 %vm350_vm3, %v563_v7  ;;  %980 = vmatprep.mubr.msk.f32.mxu1 %vm1083_vm2, %v1084_v58  ;;  %v484_v7 = vpack.c.bf16 %v1166_v51, %v1166_v51 }
 0x2bc   : > { %981 = vmatmul.mubr.msk.f32.vlgmr.msra.gmra.mrb[6].mxu1 %vm350_vm3, %v553_v8 }
 0x2bd   : > { %983 = vmatprep.mubr.msk.f32.mxu1 %vm1083_vm2, %v1084_v58 }
 0x2c0   : > { %984 = vmatmul.mubr.msk.f32.gmra.mrb[8].mxu1 %vm350_vm3, %v555_v9 }
 0x2c1   : > { %986 = vmatprep.mubr.msk.f32.mxu1 %vm1083_vm2, %v1084_v58 }
 0x2c4   : > { %987 = vmatmul.mubr.msk.f32.gmra.mrb[10].mxu1 %vm350_vm3, %v557_v10 }
 0x383   : > { %v429_v11 = vpop.f32.mrb[0].mxu1 }
 0x384   : > { %v443_v12 = vmul.f32 0.25, %v429_v11  ;;  %v959_v13 = vpop.f32.mrb[1].mxu1 }
 0x386   : > { %v447_v14 = vsel %vm446_vm5, %v443_v12, -inf }
 0x387   : > { %448 = vmax.xlane.f32.xlu1 %v447_v14  ;;  %v434_v15 = vpop.f32.mrb[2].mxu1 }
 0x388   : > { %v444_v16 = vmul.f32 0.25, %v434_v15  ;;  %v962_v17 = vpop.f32.mrb[3].mxu1 }
 0x38a   : > { %v450_v18 = vsel %vm446_vm5, %v444_v16, -inf }
 0x38b   : > { %451 = vmax.xlane.f32.xlu0 %v450_v18  ;;  %v439_v19 = vpop.f32.mrb[4].mxu1 }
 0x38c   : > { %v445_v20 = vmul.f32 0.25, %v439_v19  ;;  %v965_v21 = vpop.f32.mrb[5].mxu1 }
 0x38e   : > { %v454_v22 = vsel %vm453_vm6, %v445_v20, -inf }
 0x38f   : > { %455 = vmax.xlane.f32.xlu0 %v454_v22  ;;  %v642_v23 = vpop.f32.mrb[6].mxu1 }
 0x390   : > { %v656_v24 = vmul.f32 0.25, %v642_v23  ;;  %v982_v25 = vpop.f32.mrb[7].mxu1 }
 0x392   : > { %v659_v26 = vsel %vm446_vm5, %v656_v24, -inf }
 0x393   : > { %660 = vmax.xlane.f32.xlu0 %v659_v26  ;;  %v647_v27 = vpop.f32.mrb[8].mxu1 }
 0x394   : > { %v657_v28 = vmul.f32 0.25, %v647_v27  ;;  %v985_v29 = vpop.f32.mrb[9].mxu1 }
 0x396   : > { %v662_v30 = vsel %vm446_vm5, %v657_v28, -inf }
 0x397   : > { %663 = vmax.xlane.f32.xlu1 %v662_v30  ;;  %v652_v31 = vpop.f32.mrb[10].mxu1 }
 0x398   : > { %v658_v32 = vmul.f32 0.25, %v652_v31  ;;  %v988_v33 = vpop.f32.mrb[11].mxu1 }
 0x39a   : > { %v665_v34 = vsel %vm453_vm6, %v658_v32, -inf }
 0x39b   : > { %666 = vmax.xlane.f32.xlu0 %v665_v34 }
 0x3a8   : > { %487 = vrot.lane.b32.xlu1 %v483_v35, %s1086_s8 }
 0x414   : > { %v449_v36 = vpop.xlane.xlu1 %448 }
 0x415   : > { %v457_v37 = vsub.f32 %v443_v12, %v449_v36 }
 0x417   : > { %v460_v38 = vmul.f32 1.442695, %v457_v37 }
 0x418   : > { %v452_v39 = vpop.xlane.xlu0 %451 }
 0x419   : > { %1042 = vpow2.f32 %v460_v38  ;;  %v458_v40 = vsub.f32 %v444_v16, %v452_v39 }
 0x41b   : > { %v462_v41 = vmul.f32 1.442695, %v458_v40 }
 0x41c   : > { %v456_v42 = vpop.xlane.xlu0 %455 }
 0x41d   : > { %1044 = vpow2.f32 %v462_v41  ;;  %v459_v43 = vsub.f32 %v445_v20, %v456_v42  ;;  %v1088_v20 = vmov 0  }
 0x41e   : > { %v500_v21 = vsel %vm498_vm7, 65535, %v1088_v20 }
 0x41f   : > { %v464_v44 = vmul.f32 1.442695, %v459_v43 }
 0x420   : > { %v661_v45 = vpop.xlane.xlu0 %660 }
 0x421   : > { %1046 = vpow2.f32 %v464_v44  ;;  %v668_v46 = vsub.f32 %v656_v24, %v661_v45 }
 0x423   : > { %v1043_v47 = vpop.eup %1042  ;;  %v671_v48 = vmul.f32 1.442695, %v668_v46 }
 0x424   : > { %v664_v49 = vpop.xlane.xlu1 %663  ;;  %v466_v50 = vsel %vm446_vm5, %v1043_v47, 0.0 }
 0x425   : > { %1048 = vpow2.f32 %v671_v48  ;;  %v669_v52 = vsub.f32 %v657_v28, %v664_v49  ;;  %467 = vadd.xlane.f32.xlu1 %v466_v50 }
 0x427   : > { %v1045_v53 = vpop.eup %1044  ;;  %v673_v54 = vmul.f32 1.442695, %v669_v52 }
 0x428   : > { %v667_v55 = vpop.xlane.xlu0 %666  ;;  %v488_v56 = vpop.permute.xlu1 %487  ;;  %v469_v57 = vsel %vm446_vm5, %v1045_v53, 0.0 }
 0x429   : > { %1050 = vpow2.f32 %v673_v54  ;;  %v670_v58 = vsub.f32 %v658_v32, %v667_v55  ;;  %470 = vadd.xlane.f32.xlu0 %v469_v57  ;;  %966 = vmatprep.subr.bf16.mxu0 %v488_v56 }
 0x42a   : > { %967 = vmatpush3.bf16.msra.mxu0 %v488_v56 }
 0x42b   : > { %v1047_v59 = vpop.eup %1046  ;;  %v675_v60 = vmul.f32 1.442695, %v670_v58 }
 0x42c   : > { %v472_v61 = vsel %vm453_vm6, %v1047_v59, 0.0 }
 0x42d   : > { %1052 = vpow2.f32 %v675_v60  ;;  %473 = vadd.xlane.f32.xlu1 %v472_v61 }
 0x42f   : > { %v1049_v62 = vpop.eup %1048 }
 0x430   : > { %v677_v63 = vsel %vm446_vm5, %v1049_v62, 0.0 }
 0x431   : > { %678 = vadd.xlane.f32.xlu0 %v677_v63 }
 0x433   : > { %v1051_v3 = vpop.eup %1050 }
 0x434   : > { %v680_v4 = vsel %vm446_vm5, %v1051_v3, 0.0 }
 0x435   : > { %681 = vadd.xlane.f32.xlu1 %v680_v4 }
 0x437   : > { %v1053_v5 = vpop.eup %1052 }
 0x438   : > { %v683_v6 = vsel %vm453_vm6, %v1053_v5, 0.0 }
 0x439   : > { %684 = vadd.xlane.f32.xlu0 %v683_v6 }
 0x446   : > { %694 = vrot.lane.b32.xlu1 %v483_v35, %s1087_s9 }
 0x44a   : > { %696 = vrot.lane.b32.xlu1 %v484_v7, %s1087_s9 }
 0x44f   : > { %489 = vrot.lane.b32.xlu0 %v484_v7, %s1086_s8 }
 0x4b2   : > { %v468_v8 = vpop.xlane.xlu1 %467 }
 0x4b3   : > { %1054 = vrcp.f32 %v468_v8 }
 0x4b6   : > { %v471_v9 = vpop.xlane.xlu0 %470 }
 0x4b7   : > { %1056 = vrcp.f32 %v471_v9 }
 0x4ba   : > { %v474_v10 = vpop.xlane.xlu1 %473 }
 0x4bb   : > { %1058 = vrcp.f32 %v474_v10 }
 0x4bd   : > { %v1055_v12 = vpop.eup %1054 }
 0x4be   : > { %v679_v11 = vpop.xlane.xlu0 %678  ;;  %v478_v15 = vmul.f32 %v1055_v12, %v1043_v47 }
 0x4bf   : > { %1060 = vrcp.f32 %v679_v11 }
 0x4c1   : > { %v1057_v13 = vpop.eup %1056 }
 0x4c2   : > { %v682_v14 = vpop.xlane.xlu1 %681  ;;  %v479_v16 = vmul.f32 %v1057_v13, %v1045_v53 }
 0x4c3   : > { %1062 = vrcp.f32 %v682_v14 }
 0x4c4   : > { %v481_v17 = vpack.c.bf16 %v479_v16, %v478_v15 }
 0x4c5   : > { %v1059_v18 = vpop.eup %1058 }
 0x4c6   : > { %v685_v51 = vpop.xlane.xlu0 %684  ;;  %970 = vmatprep.mubr.msk.bf16.mxu0 %vm446_vm5, %v481_v17  ;;  %v695_v19 = vpop.permute.xlu1 %694  ;;  %v480_v24 = vmul.f32 %v1059_v18, %v1047_v59 }
 0x4c7   : > { %1064 = vrcp.f32 %v685_v51  ;;  %v915_v51 = vld [vmem:[%s1252_s3 + $0x2] ss:$0 sm:$0xff] }
 0x4c8   : > { %v482_v30 = vpack.c.bf16 %v480_v24, %v480_v24 }
 0x4c9   : > { %v1061_v23 = vpop.eup %1060 }
 0x4ca   : > { %v490_v22 = vpop.permute.xlu0 %489  ;;  %v697_v27 = vpop.permute.xlu1 %696  ;;  %v689_v28 = vmul.f32 %v1061_v23, %v1049_v62 }
 0x4cb   : > { %v502_v25 = vand.u32 %v500_v21, %v490_v22  ;;  %v706_v33 = vand.u32 %v697_v27, %v500_v21 }
 0x4cd   : > { %v1063_v26 = vpop.eup %1062  ;;  %968 = vmatprep.subr.bf16.mxu0 %v502_v25 }
 0x4ce   : > { %969 = vmatpush3.bf16.msra.mxu0 %v502_v25  ;;  %v690_v29 = vmul.f32 %v1063_v26, %v1051_v3 }
 0x4cf   : > { %989 = vmatprep.subr.bf16.mxu0 %v695_v19 }
 0x4d0   : > { %v692_v31 = vpack.c.bf16 %v690_v29, %v689_v28 }
 0x4d1   : > { %v1065_v32 = vpop.eup %1064  ;;  %971 = vmatmul.mubr.msk.bf16.vlgmr.msra.gmra.mrb[4].mxu0 %vm446_vm5, %v482_v30 }
 0x4d2   : > { %990 = vmatpush3.bf16.msra.mxu0 %v695_v19  ;;  %993 = vmatprep.mubr.msk.bf16.mxu0 %vm446_vm5, %v692_v31  ;;  %v691_v34 = vmul.f32 %v1065_v32, %v1053_v5  ;;  %v916_v19 = vld [vmem:[%s1252_s3 + $0x3] ss:$0 sm:$0xff] }
 0x4d3   : > { %991 = vmatprep.subr.bf16.mxu0 %v706_v33 }
 0x4d4   : > { %v693_v35 = vpack.c.bf16 %v691_v34, %v691_v34 }
 0x4d6   : > { %992 = vmatpush3.bf16.msra.mxu0 %v706_v33 }
 0x4d9   : > { %994 = vmatmul.mubr.msk.bf16.vlgmr.msra.gmra.mrb[8].mxu0 %vm446_vm5, %v693_v35 }
 0x5a4   : > { %v972_v36 = vpop.f32.mrb[4].mxu0 }
 0x5a5   : > { %v538_v37 = vpop.f32.mrb[5].mxu0 }
 0x5a6   : > { %v973_v38 = vpop.f32.mrb[6].mxu0 }
 0x5a7   : > { %v541_v39 = vpop.f32.mrb[7].mxu0 }
 0x5ac   : > { %v995_v40 = vpop.f32.mrb[8].mxu0 }
 0x5ad   : > { %v742_v41 = vpop.f32.mrb[9].mxu0 }
 0x5ae   : > { %759 = vrot.lane.b32.xlu1 %v742_v41, %s1089_s10  ;;  %v996_v42 = vpop.f32.mrb[10].mxu0 }
 0x5af   : > { %v745_v43 = vpop.f32.mrb[11].mxu0 }
 0x5b0   : > { %761 = vrot.lane.b32.xlu0 %v745_v43, %s1089_s10 }
 0x5b2   : > { %763 = vrot.lane.b32.xlu1 %v995_v40, %s1089_s10 }
 0x620   : > { %v760_v44 = vpop.permute.xlu1 %759 }
 0x621   : > { %v768_v45 = vsel %vm350_vm3, %v538_v37, %v760_v44 }
 0x622   : > { %v762_v46 = vpop.permute.xlu0 %761  ;;  %v771_v47 = vadd.f32 %v768_v45, %v1131_v0 }
 0x623   : > { %v769_v48 = vsel %vm350_vm3, %v541_v39, %v762_v46 }
 0x624   : > { %v764_v49 = vpop.permute.xlu1 %763  ;;  %v774_v50 = vsel %vm206_vm0, %v771_v47, 0.0  ;;  %v772_v52 = vadd.f32 %v769_v48, %v1135_v2 }
 0x625   : > { %v770_v53 = vsel %vm350_vm3, %v972_v36, %v764_v49  ;;  %775 = vadd.xlane.f32.xlu0 %v774_v50 }
 0x626   : > { %v777_v54 = vsel %vm206_vm0, %v772_v52, 0.0  ;;  %v773_v55 = vadd.f32 %v770_v53, %v1133_v1 }
 0x627   : > { %778 = vadd.xlane.f32.xlu1 %v777_v54 }
 0x628   : > { %v780_v56 = vsel %vm213_vm1, %v773_v55, 0.0 }
 0x629   : > { %781 = vadd.xlane.f32.xlu0 %v780_v56 }
 0x6b2   : > { %v776_v57 = vpop.xlane.xlu0 %775 }
 0x6b3   : > { %v783_v0 = vmul.f32 0.03125, %v776_v57 }
 0x6b4   : > { %v779_v58 = vpop.xlane.xlu1 %778 }
 0x6b5   : > { %v786_v59 = vsub.f32 %v771_v47, %v783_v0  ;;  %v784_v60 = vmul.f32 0.03125, %v779_v58 }
 0x6b6   : > { %v782_v61 = vpop.xlane.xlu0 %781 }
 0x6b7   : > { %v787_v62 = vsub.f32 %v772_v52, %v784_v60  ;;  %v785_v63 = vmul.f32 0.03125, %v782_v61  ;;  %v789_v2 = vmul.f32 %v786_v59, %v786_v59 }
 0x6b9   : > { %v788_v3 = vsub.f32 %v773_v55, %v785_v63  ;;  %v792_v4 = vsel %vm206_vm0, %v789_v2, 0.0  ;;  %v790_v5 = vmul.f32 %v787_v62, %v787_v62 }
 0x6ba   : > { %793 = vadd.xlane.f32.xlu0 %v792_v4 }
 0x6bb   : > { %v791_v6 = vmul.f32 %v788_v3, %v788_v3  ;;  %v795_v1 = vsel %vm206_vm0, %v790_v5, 0.0 }
 0x6bd   : > { %v798_v7 = vsel %vm213_vm1, %v791_v6, 0.0 }
 0x6be   : > { %796 = vadd.xlane.f32.xlu0 %v795_v1  ;;  %799 = vadd.xlane.f32.xlu1 %v798_v7 }
 0x747   : > { %v794_v8 = vpop.xlane.xlu0 %793 }
 0x748   : > { %v801_v9 = vmul.f32 0.03125, %v794_v8 }
 0x74a   : > { %v804_v10 = vadd.f32 1e-05, %v801_v9 }
 0x74b   : > { %v800_v11 = vpop.xlane.xlu1 %799  ;;  %v797_v12 = vpop.xlane.xlu0 %796 }
 0x74c   : > { %1066 = vrsqrt.f32 %v804_v10  ;;  %v803_v13 = vmul.f32 0.03125, %v800_v11  ;;  %v802_v14 = vmul.f32 0.03125, %v797_v12 }
 0x74e   : > { %v806_v15 = vadd.f32 1e-05, %v803_v13  ;;  %v805_v16 = vadd.f32 1e-05, %v802_v14 }
 0x750   : > { %1068 = vrsqrt.f32 %v806_v15 }
 0x751   : > { %1070 = vrsqrt.f32 %v805_v16 }
 0x756   : > { %v1067_v17 = vpop.eup %1066 }
 0x757   : > { %v810_v18 = vmul.f32 %v1067_v17, %v786_v59 }
 0x759   : > { %v817_v20 = vmul.f32 %v915_v51, %v810_v18 }
 0x75a   : > { %v1069_v21 = vpop.eup %1068 }
 0x75b   : > { %v1071_v22 = vpop.eup %1070  ;;  %v824_v23 = vadd.f32 %v916_v19, %v817_v20  ;;  %v812_v24 = vmul.f32 %v1069_v21, %v788_v3 }
 0x75c   : > { %v811_v25 = vmul.f32 %v1071_v22, %v787_v62 }
 0x75d   : > { %827 = vst.msk [vmem:[%s197_s20] sm:$0xff] %vm206_vm0, %v824_v23  ;;  %v819_v26 = vmul.f32 %v915_v51, %v812_v24 }
 0x75e   : > { %v818_v27 = vmul.f32 %v915_v51, %v811_v25 }
 0x75f   : > { %v826_v28 = vadd.f32 %v916_v19, %v819_v26 }
 0x760   : > { %v825_v29 = vadd.f32 %v916_v19, %v818_v27 }
 0x761   : > { %829 = vst.msk [vmem:[%s197_s20 + $0x10] sm:$0x1] %vm213_vm1, %v826_v28 }
 0x762   : > { %828 = vst.msk [vmem:[%s197_s20 + $0x8] sm:$0xff] %vm206_vm0, %v825_v29 }
 0x763 PF: > { %s14_s15 = sadd.s32 1, %s1078_s15  }
 0x764   : > { %p11_p4 = scmp.ge.s32.totalorder %s14_s15, 4  }
 0x766   :  { %13 = sbr.rel (!%p11_p4) target bundleno = 1 (0x1), region = 66 }

</bundles_post_ra>
